<compile_context>
chip_gen: v6e
topology: v6e:2x2x1
jax: 0.10.0
libtpu: 0.0.40
codegen_flags: <defaults>
</compile_context>

<pallas_src>
import functools
import math

import jax
import jax.numpy as jnp
from jax.experimental import pallas as pl
from jax.experimental.pallas import tpu as pltpu

_VMEM_LIMIT = 32 * 1024 * 1024  # explicit scoped-VMEM limit, safe on v5e/v6e/v7x


def _round_up(a, b):
    return (a + b - 1) // b * b


# ---------------------------------------------------------------------------
# Small-N path: one fused kernel (support + propagation + reparametrization).
# ---------------------------------------------------------------------------
def _fused_kernel(adj_ref, x_ref, w_ref, eps_ref, out_ref, *, fp):
    # support for ALL rows (every adj row-block needs it); tiny at this scale.
    support = jnp.dot(x_ref[...], w_ref[...], preferred_element_type=jnp.float32)
    prop = jnp.dot(adj_ref[...], support.astype(adj_ref.dtype),
                   preferred_element_type=jnp.float32)           # (tm, 2*fp) = [mu | lv]
    mu = prop[:, :fp]
    lv = prop[:, fp:]
    z = mu + jnp.exp(0.5 * lv) * eps_ref[...]                    # f32 EUP/VPU math
    out_ref[:, :fp] = z                                          # lane-aligned stores
    out_ref[:, fp:] = prop                                       # [mu | lv] contiguous


def _gcn_small(adj_p, x_p, w_cat, eps_p, *, fp):
    n_pad, fin = x_p.shape
    tm = n_pad // 2                       # 2 row programs -> both v7x TCs get work
    return pl.pallas_call(
        functools.partial(_fused_kernel, fp=fp),
        out_shape=jax.ShapeDtypeStruct((n_pad, 3 * fp), jnp.float32),
        grid_spec=pltpu.PrefetchScalarGridSpec(
            num_scalar_prefetch=0,
            grid=(2,),
            in_specs=[
                pl.BlockSpec((tm, n_pad), lambda i: (i, 0)),      # adj row block
                pl.BlockSpec((n_pad, fin), lambda i: (0, 0)),     # full x
                pl.BlockSpec((fin, 2 * fp), lambda i: (0, 0)),    # fused weights
                pl.BlockSpec((tm, fp), lambda i: (i, 0)),         # eps row block
            ],
            out_specs=pl.BlockSpec((tm, 3 * fp), lambda i: (i, 0)),
        ),
        compiler_params=pltpu.CompilerParams(
            dimension_semantics=("parallel",),
            vmem_limit_bytes=_VMEM_LIMIT),
    )(adj_p, x_p, w_cat, eps_p)


# ---------------------------------------------------------------------------
# Large-N path, stage 1: support = x @ [W_mu | W_lv], computed ONCE.
# ---------------------------------------------------------------------------
def _support_kernel(x_ref, w_ref, s_ref):
    s_ref[...] = jnp.dot(x_ref[...], w_ref[...],
                         preferred_element_type=jnp.float32).astype(s_ref.dtype)


# ---------------------------------------------------------------------------
# Large-N path, stage 2: K-tiled propagation + reparametrization.
#   grid = (rows, K);  K last, "arbitrary";  f32 VMEM accumulator per row block.
# ---------------------------------------------------------------------------
def _prop_reparam_kernel(adj_ref, s_ref, eps_ref, out_ref, acc_ref, *, fp):
    k = pl.program_id(1)

    @pl.when(k == 0)
    def _():
        acc_ref[...] = jnp.zeros_like(acc_ref)

    acc_ref[...] += jnp.dot(adj_ref[...], s_ref[...],
                            preferred_element_type=jnp.float32)

    @pl.when(k == pl.num_programs(1) - 1)
    def _():
        prop = acc_ref[...]                        # (tm, 2*fp) = [mu | lv]
        mu = prop[:, :fp]
        lv = prop[:, fp:]
        z = mu + jnp.exp(0.5 * lv) * eps_ref[...]
        out_ref[:, :fp] = z
        out_ref[:, fp:] = prop


def _gcn_large(adj_p, x_p, w_cat, eps_p, *, fp, tm, tk, support_dtype):
    n_pad, fin = x_p.shape

    support = pl.pallas_call(
        _support_kernel,
        out_shape=jax.ShapeDtypeStruct((n_pad, 2 * fp), support_dtype),
        grid_spec=pltpu.PrefetchScalarGridSpec(
            num_scalar_prefetch=0,
            grid=(n_pad // tm,),
            in_specs=[
                pl.BlockSpec((tm, fin), lambda i: (i, 0)),
                pl.BlockSpec((fin, 2 * fp), lambda i: (0, 0)),
            ],
            out_specs=pl.BlockSpec((tm, 2 * fp), lambda i: (i, 0)),
        ),
        compiler_params=pltpu.CompilerParams(
            dimension_semantics=("parallel",),
            vmem_limit_bytes=_VMEM_LIMIT),
    )(x_p, w_cat)

    return pl.pallas_call(
        functools.partial(_prop_reparam_kernel, fp=fp),
        out_shape=jax.ShapeDtypeStruct((n_pad, 3 * fp), jnp.float32),
        grid_spec=pltpu.PrefetchScalarGridSpec(
            num_scalar_prefetch=0,
            grid=(n_pad // tm, n_pad // tk),         # contraction (K) axis LAST
            in_specs=[
                pl.BlockSpec((tm, tk), lambda i, k: (i, k)),       # adj tile (streamed)
                pl.BlockSpec((tk, 2 * fp), lambda i, k: (k, 0)),   # support K block
                pl.BlockSpec((tm, fp), lambda i, k: (i, 0)),       # eps row block
            ],
            out_specs=pl.BlockSpec((tm, 3 * fp), lambda i, k: (i, 0)),
            scratch_shapes=[pltpu.VMEM((tm, 2 * fp), jnp.float32)],
        ),
        compiler_params=pltpu.CompilerParams(
            dimension_semantics=("parallel", "arbitrary"),
            vmem_limit_bytes=_VMEM_LIMIT),
    )(adj_p, support, eps_p)


# ---------------------------------------------------------------------------
# Public wrapper
# ---------------------------------------------------------------------------
def gcn_gaussian_sample(adj, x, w_mu, w_lv, eps, *,
                        mxu_dtype=None, small_n_threshold=1024,
                        tm=512, tk=512):
    """Forward of GCNGaussianSample. Returns (z, mu, log_var), each (N, Fout) f32.

    mxu_dtype: optional low-precision MXU operand dtype (e.g. jnp.bfloat16).
      The caller must supply `adj` already in that dtype (no wrapper cast --
      a one-off cast costs an extra full HBM pass over the N x N matrix).
      Accumulation and the exp/reparam math stay f32.
    tm / tk: stage-2 row-block / contraction-block sizes (large-N path). Tune
      per generation: bigger tk for v5e/v6e (bandwidth-bound, plentiful VMEM),
      smaller tiles for v7x (64 MiB physical VMEM).
    """
    n, fin = x.shape
    fout = w_mu.shape[1]
    assert adj.shape[0] == adj.shape[1] == n, "GCN input error!"
    assert w_mu.shape == (fin, fout) and w_lv.shape == (fin, fout)
    assert eps.shape == (n, fout)
    if mxu_dtype is not None:
        assert adj.dtype == mxu_dtype, (
            "pass adj already cast to mxu_dtype (cache it across calls)")

    # Lane padding: mu / log_var / z each fill whole 128-lane vregs.
    fp = _round_up(fout, 128)
    w_cat = jnp.zeros((fin, 2 * fp), jnp.float32)
    w_cat = w_cat.at[:, :fout].set(w_mu.astype(jnp.float32))
    w_cat = w_cat.at[:, fp:fp + fout].set(w_lv.astype(jnp.float32))

    small = n <= small_n_threshold
    if small:
        n_pad = _round_up(n, 16)                 # 2 sublane-aligned row blocks
    else:
        assert (tk % tm == 0) or (tm % tk == 0)
        n_pad = _round_up(n, max(tm, tk))

    # Zero-pad rows/cols once; padded rows/cols contribute exact zeros.
    adj_p = adj if n_pad == n else jnp.pad(adj, ((0, n_pad - n), (0, n_pad - n)))
    x_p = x if n_pad == n else jnp.pad(x, ((0, n_pad - n), (0, 0)))
    eps_p = jnp.pad(eps, ((0, n_pad - n), (0, fp - fout)))

    if mxu_dtype is not None:
        x_p = x_p.astype(mxu_dtype)              # small operands; cheap cast
        w_cat = w_cat.astype(mxu_dtype)
    support_dtype = jnp.float32 if mxu_dtype is None else mxu_dtype

    if small:
        packed = _gcn_small(adj_p, x_p, w_cat, eps_p, fp=fp)
    else:
        packed = _gcn_large(adj_p, x_p, w_cat, eps_p, fp=fp, tm=tm, tk=tk,
                            support_dtype=support_dtype)

    z = packed[:n, :fout]
    mu = packed[:n, fp:fp + fout]
    log_var = packed[:n, 2 * fp:2 * fp + fout]
    return z, mu, log_var


def init_gcn_weight(key, fin, fout):
    # matches GCNLayer.reset_parameters: uniform(-std, std), std = 1/sqrt(fout)
    std = 1.0 / math.sqrt(fout)
    return jax.random.uniform(key, (fin, fout), jnp.float32, -std, std)


if __name__ == "__main__":
    def reference(adj, x, w_mu, w_lv, eps):
        mu = adj @ (x @ w_mu)
        lv = adj @ (x @ w_lv)
        return mu + jnp.exp(0.5 * lv) * eps, mu, lv

    key = jax.random.PRNGKey(0)
    keys = jax.random.split(key, 8)

    # ---- small-N fused path (demo scale) -----------------------------------
    N, F_IN, F_OUT = 64, 32, 16
    adj_raw = jax.random.uniform(keys[0], (N, N), jnp.float32)
    adj = 0.5 * (adj_raw + adj_raw.T) / N              # normalized-ish adjacency
    x = jax.random.normal(keys[1], (N, F_IN), jnp.float32)
    w_mu = init_gcn_weight(keys[2], F_IN, F_OUT)
    w_lv = init_gcn_weight(keys[3], F_IN, F_OUT)
    # eps ~ N(0,1) sampled outside the kernel (torch.randn equivalent)
    eps = jax.random.normal(keys[4], (N, F_OUT), jnp.float32)

    z, mu, lv = gcn_gaussian_sample(adj, x, w_mu, w_lv, eps)
    jax.block_until_ready((z, mu, lv))
    z_r, mu_r, lv_r = reference(adj, x, w_mu, w_lv, eps)
    assert jnp.allclose(mu, mu_r, atol=1e-5, rtol=1e-5)
    assert jnp.allclose(lv, lv_r, atol=1e-5, rtol=1e-5)
    assert jnp.allclose(z, z_r, atol=1e-5, rtol=1e-5)

    # ---- exercise the two-stage K-tiled path (non-divisible N, padded) -----
    N2 = 640
    adj2_raw = jax.random.uniform(keys[5], (N2, N2), jnp.float32)
    adj2 = 0.5 * (adj2_raw + adj2_raw.T) / N2
    x2 = jax.random.normal(keys[6], (N2, F_IN), jnp.float32)
    eps2 = jax.random.normal(keys[7], (N2, F_OUT), jnp.float32)

    z2, mu2, lv2 = gcn_gaussian_sample(adj2, x2, w_mu, w_lv, eps2,
                                       small_n_threshold=256)   # force large path
    jax.block_until_ready((z2, mu2, lv2))
    z2_r, mu2_r, lv2_r = reference(adj2, x2, w_mu, w_lv, eps2)
    assert jnp.allclose(mu2, mu2_r, atol=2e-5, rtol=1e-5)
    assert jnp.allclose(lv2, lv2_r, atol=2e-5, rtol=1e-5)
    assert jnp.allclose(z2, z2_r, atol=2e-5, rtol=1e-5)

    print("KERNEL_OK")
</pallas_src>

<mosaic_0001>
module attributes {stable_mosaic.version = 11 : i64} {
  func.func @_fused_kernel(%arg0: i32, %arg1: memref<32x64xf32, #tpu.memory_space<vmem>>, %arg2: memref<64x32xf32, #tpu.memory_space<vmem>>, %arg3: memref<32x256xf32, #tpu.memory_space<vmem>>, %arg4: memref<32x128xf32, #tpu.memory_space<vmem>>, %arg5: memref<32x384xf32, #tpu.memory_space<vmem>>) attributes {dimension_semantics = [#tpu.dimension_semantics<parallel>], iteration_bounds = array<i64: 2>, scalar_prefetch = 0 : i64, scratch_operands = 0 : i64, tpu.core_type = #tpu.core_type<tc>, window_params = [{transform_indices = @transform_0, window_bounds = array<i64: 32, 64>}, {pipeline_mode = #tpu.pipeline_mode<synchronous>, transform_indices = @transform_1, window_bounds = array<i64: 64, 32>}, {pipeline_mode = #tpu.pipeline_mode<synchronous>, transform_indices = @transform_2, window_bounds = array<i64: 32, 256>}, {transform_indices = @transform_3, window_bounds = array<i64: 32, 128>}, {transform_indices = @transform_4, window_bounds = array<i64: 32, 384>}]} {
    %c0 = arith.constant 0 : index
    %c0_0 = arith.constant 0 : index
    %0 = vector.load %arg2[%c0, %c0_0] : memref<64x32xf32, #tpu.memory_space<vmem>>, vector<64x32xf32>
    %c0_1 = arith.constant 0 : index
    %c0_2 = arith.constant 0 : index
    %1 = vector.load %arg3[%c0_1, %c0_2] : memref<32x256xf32, #tpu.memory_space<vmem>>, vector<32x256xf32>
    %cst = arith.constant dense<0.000000e+00> : vector<64x256xf32>
    %2 = tpu.matmul %0, %1, %cst {dimension_numbers = #tpu.dot_dimension_numbers<[1], [0], [0], [1], [0, 0, 1, 1], [], []>} : vector<64x32xf32>, vector<32x256xf32>, vector<64x256xf32> -> vector<64x256xf32>
    %c0_3 = arith.constant 0 : index
    %c0_4 = arith.constant 0 : index
    %3 = vector.load %arg1[%c0_3, %c0_4] : memref<32x64xf32, #tpu.memory_space<vmem>>, vector<32x64xf32>
    %cst_5 = arith.constant dense<0.000000e+00> : vector<32x256xf32>
    %4 = tpu.matmul %3, %2, %cst_5 {dimension_numbers = #tpu.dot_dimension_numbers<[1], [0], [0], [1], [0, 0, 1, 1], [], []>} : vector<32x64xf32>, vector<64x256xf32>, vector<32x256xf32> -> vector<32x256xf32>
    %5 = vector.extract_strided_slice %4 {offsets = [0, 0], sizes = [32, 128], strides = [1, 1]} : vector<32x256xf32> to vector<32x128xf32>
    %6 = vector.extract_strided_slice %4 {offsets = [0, 128], sizes = [32, 128], strides = [1, 1]} : vector<32x256xf32> to vector<32x128xf32>
    %cst_6 = arith.constant 5.000000e-01 : f32
    %7 = vector.broadcast %cst_6 : f32 to vector<32x128xf32>
    %8 = arith.mulf %7, %6 : vector<32x128xf32>
    %9 = math.exp %8 : vector<32x128xf32>
    %c0_7 = arith.constant 0 : index
    %c0_8 = arith.constant 0 : index
    %10 = vector.load %arg4[%c0_7, %c0_8] : memref<32x128xf32, #tpu.memory_space<vmem>>, vector<32x128xf32>
    %11 = arith.mulf %9, %10 : vector<32x128xf32>
    %12 = arith.addf %5, %11 : vector<32x128xf32>
    %c0_9 = arith.constant 0 : index
    %c0_10 = arith.constant 0 : index
    %13 = vector.load %arg5[%c0_9, %c0_10] : memref<32x384xf32, #tpu.memory_space<vmem>>, vector<32x128xf32>
    tpu.vector_store %arg5[%c0_9, %c0_10], %12 {strides = array<i32>} : memref<32x384xf32, #tpu.memory_space<vmem>>, vector<32x128xf32>,
    %c0_11 = arith.constant 0 : index
    %c128 = arith.constant 128 : index
    %14 = vector.load %arg5[%c0_11, %c128] : memref<32x384xf32, #tpu.memory_space<vmem>>, vector<32x256xf32>
    tpu.vector_store %arg5[%c0_11, %c128], %4 {strides = array<i32>} : memref<32x384xf32, #tpu.memory_space<vmem>>, vector<32x256xf32>,
    return
  }
  func.func @transform_0(%arg0: i32) -> (i32, i32) {
    %c0_i32 = arith.constant 0 : i32
    %c0_i32_0 = arith.constant 0 : i32
    return %arg0, %c0_i32 : i32, i32
  }
  func.func @transform_1(%arg0: i32) -> (i32, i32) {
    %c0_i32 = arith.constant 0 : i32
    %c0_i32_0 = arith.constant 0 : i32
    %c0_i32_1 = arith.constant 0 : i32
    return %c0_i32, %c0_i32_0 : i32, i32
  }
  func.func @transform_2(%arg0: i32) -> (i32, i32) {
    %c0_i32 = arith.constant 0 : i32
    %c0_i32_0 = arith.constant 0 : i32
    %c0_i32_1 = arith.constant 0 : i32
    return %c0_i32, %c0_i32_0 : i32, i32
  }
  func.func @transform_3(%arg0: i32) -> (i32, i32) {
    %c0_i32 = arith.constant 0 : i32
    %c0_i32_0 = arith.constant 0 : i32
    return %arg0, %c0_i32 : i32, i32
  }
  func.func @transform_4(%arg0: i32) -> (i32, i32) {
    %c0_i32 = arith.constant 0 : i32
    %c0_i32_0 = arith.constant 0 : i32
    return %arg0, %c0_i32 : i32, i32
  }
}

</mosaic_0001>

<bundles_post_ra>
// kernel: tpu_custom_call.1
= control target key start
LH: loop header
LB: loop body
LE: loop exit
PB: predicated region body
PF: predicated region fallthrough
CT: control target
= control target key end

     0   :  { %9 = vsyncpa [#allocation3], 0  ;;  %s1173_s0 = inlined_call_operand.vmem [shape: f32[64,64], index: 0, kind: input, shape index: {}]   ;;  %s1174_s1 = inlined_call_operand.vmem [shape: f32[64,32], index: 1, kind: input, shape index: {}]   ;;  %s1175_s2 = inlined_call_operand.hbm [shape: f32[32,256], index: 2, kind: input, shape index: {}]   ;;  %s1176_s3 = inlined_call_operand.hbm [shape: f32[64,128], index: 3, kind: input, shape index: {}]   ;;  %s1177_s4 = inlined_call_operand.hbm [shape: f32[64,384], index: 4, kind: output, shape index: {}]  }
   0x1   :  { %10 = vsyncpa [#allocation6], 0 }
   0x2   :  { %12 = vsyncpa [#allocation6 + $0x1], 0 }
   0x3   :  { %13 = vsyncpa [#allocation4], 0 }
   0x4   :  { %15 = vsyncpa [#allocation4 + $0x1], 0  ;;  %s926_s15 = smov 0   ;;  %s928_s16 = smov 0  }
   0x5   :  { %s930_s17 = smov 0   ;;  %s932_s18 = smov 0  }
   0x6 LB: > { %s947_s19 = sadd.s32 4294967295, %s889_s18   ;;  %s663_s20 = sadd.s32 4294967294, %s889_s18   ;;  %s889_s18 = sphi %s932_s18, %s1199_s18   ;;  %s885_s17 = sphi %s930_s17, %s1198_s17   ;;  %s881_s16 = sphi %s928_s16, %s1197_s16   ;;  %s877_s15 = sphi %s926_s15, %s1196_s15  }
   0x7   : > { %p109_p0 = scmp.ne.s32.totalorder %s881_s16, %s877_s15  ;;  %p1178_p1 = scmp.eq.s32.totalorder %s947_s19, 0 }
   0x8   : > { %p139_p3 = scmp.eq.s32.totalorder %s663_s20, 1  ;;  %p664_p5 = scmp.ge.s32.totalorder %s889_s18, 1 }
   0x9   : > { %p956_p4 = por %p1178_p1, %p109_p0  ;;  %p146_p7 = scmp.lt.s32.totalorder %s889_s18, 3 }
   0xa   : > { %p961_p6 = por %p139_p3, %p109_p0  ;;  %s891_s24 = smov [#allocation2]  }
   0xb   : > { %s1182_s21 = scalar_select %p956_p4, 1, 0 }
   0xc   : > { %s1183_s22 = scalar_select %p961_p6, 1, 0 }
   0xd   : > { %p966_p8 = pnand %p664_p5, %p146_p7  ;;  %s161_s25 = sshll.u32 %s891_s24, 4  ;;  %s162_s25 = int_to_ptr.vmem [resolvable:$true] %s161_s25 }
   0xe   : > { %s980_s27 = sadd.s32 1, %s889_s18   ;;  %s96_s28 = sadd.s32 1, %s885_s17 }
   0xf   : > { %s1184_s23 = scalar_select %p966_p8, 1, 0 }
  0x10   : > { %p703_p9 = pneg %p966_p8  ;;  %s93_s29 = ssub.s32 %s889_s18, %s980_s27 }
  0x11   : > { %s778_s30 = scalar_lea.vmem %s162_s25, 1024  ;;  %p786_p5 = scmp.lt.s32.totalorder %s162_s25, %s162_s25 }
  0x12   : > { %p975_p11 = pnand %p703_p9, %p1178_p1  ;;  %p779_p13 = scmp.ne.s32.totalorder %s162_s25, %s778_s30 }
  0x13   : > { %p787_p7 = scmp.lt.s32.totalorder %s778_s30, %s778_s30 }
  0x14   : > { %p769_p12 = pneg %p975_p11 }
  0x15   : > { %p788_p10 = por %p787_p7, %p786_p5 }
  0x16   : > { %p781_p0 = pnand %p779_p13, %p769_p12 }
  0x18   : > { %p782_p3 = pneg %p781_p0 }
  0x1a   : > { %p789_p2 = pnand %p788_p10, %p782_p3 }
  0x1c   : > { %792 = shalt.err (!%p789_p2)
}
  0x1d   : > { %s892_s5 = smov 256   ;;  %s893_s6 = smov 16  }
  0x1e   : > { %706 = dma.hbm_to_vmem [thread:$0]  (!%p975_p11), %s1175_s2, 1024, %s162_s25, [#allocation3], %s892_s5, %s892_s5, %s893_s6  }
  0x1f   : > { %p94_p9 = scmp.eq.s32.totalorder %s93_s29, 0  ;;  %p103_p12 = scmp.ne.s32.totalorder %s885_s17, %s881_s16 }
  0x20   : > { %p104_p10 = scmp.eq.s32.totalorder %s889_s18, 0  ;;  %p716_p2 = scmp.lt.s32.totalorder %s889_s18, 2 }
  0x21   : > { %s997_s9 = scalar_select %p94_p9, %s885_s17, %s96_s28  }
  0x22   : > { %p105_p13 = por %p104_p10, %p103_p12  ;;  %p1186_p0 = scmp.eq.s32.totalorder %s947_s19, 1 }
  0x23   : > { %s184_s11 = sand.u32 1, %s885_s17   ;;  %s692_s12 = sshll.u32 %s889_s18, 9 }
  0x24   : > { %p1001_p3 = por %p1186_p0, %p103_p12  ;;  %s667_s13 = sshll.u32 %s184_s11, 5 }
  0x25   : > { %s1010_s24 = scalar_lea.hbm %s1176_s3, %s692_s12  ;;  %s188_s25 = scalar_lea.vmem [#allocation5], %s667_s13 }
  0x26   : > { %s1187_s10 = scalar_select %p1001_p3, 1, 0 }
  0x27   : > { %s195_s26 = sshll.u32 %s188_s25, 4  ;;  %p1012_p11 = pnand %p716_p2, %p105_p13  ;;  %s1016_s26 = int_to_ptr.vmem [resolvable:$true] %s195_s26 }
  0x28   : > { %s1018_s29 = scalar_lea.sflag [#allocation6], %s184_s11  ;;  %s793_s30 = scalar_lea.hbm %s1010_s24, 512 }
  0x29   : > { %p794_p5 = scmp.ne.s32.totalorder %s1010_s24, %s793_s30  ;;  %p795_p7 = pneg %p1012_p11 }
  0x2a   : > { %s798_s7 = scalar_lea.hbm %s1176_s3, 1024  ;;  %p799_p10 = scmp.lt.s32.totalorder %s1010_s24, %s1176_s3 }
  0x2b   : > { %p796_p9 = pnand %p795_p7, %p794_p5  ;;  %p800_p2 = scmp.lt.s32.totalorder %s798_s7, %s793_s30 }
  0x2d   : > { %p797_p12 = pneg %p796_p9  ;;  %p801_p13 = por %p800_p2, %p799_p10 }
  0x2f   : > { %p802_p0 = pnand %p801_p13, %p797_p12 }
  0x31   : > { %805 = shalt.err (!%p802_p0)
}
  0x32   : > { %s806_s11 = scalar_lea.vmem %s1016_s26, 512  ;;  %s894_s13 = smov [#allocation5]  }
  0x33   : > { %p807_p1 = scmp.ne.s32.totalorder %s1016_s26, %s806_s11  ;;  %s811_s14 = sshll.u32 %s894_s13, 4  ;;  %s812_s14 = int_to_ptr.vmem [resolvable:$false] %s811_s14 }
  0x34   : > { %s813_s20 = scalar_lea.vmem %s812_s14, 1024  ;;  %p814_p9 = scmp.lt.s32.totalorder %s1016_s26, %s812_s14 }
  0x35   : > { %p809_p6 = pnand %p807_p1, %p795_p7  ;;  %p815_p3 = scmp.lt.s32.totalorder %s813_s20, %s806_s11 }
  0x37   : > { %p810_p5 = pneg %p809_p6  ;;  %p816_p4 = por %p815_p3, %p814_p9 }
  0x39   : > { %p817_p8 = pnand %p816_p4, %p810_p5 }
  0x3b   : > { %820 = shalt.err (!%p817_p8)
}
  0x3c   : > { %s895_s25 = smov 128   ;;  %s896_s30 = smov 8  }
  0x3d   : > { %710 = dma.hbm_to_vmem [thread:$0]  (!%p1012_p11), %s1010_s24, 512, %s1016_s26, %s1018_s29, %s895_s25, %s895_s25, %s896_s30  }
  0x3e   : > { %p1189_p1 = scmp.ne.s32.totalorder %s1184_s23, 0 }
  0x3f   : > { %p1190_p6 = scmp.eq.s32.totalorder (!%p1189_p1), %s947_s19, 0 }
  0x40   : > { %207 = sbr.rel (%p1189_p1) target bundleno = 566 (0x236), region = 36 }
  0x45   : > { %864 = dma.done.wait (%p1190_p6), [#allocation3], 1024   ;;  %p1191_p7 = pmov %p1190_p6 }
  0x46   : > { %s1046_s5 = sand.u32 1, %s881_s16   ;;  %p1192_p4 = scmp.ne.s32.totalorder %s1182_s21, 0 }
  0x47   : > { %866 = vsyncadd (%p1191_p7), [#allocation3], 4294966272  ;;  %s672_s6 = sshll.u32 %s1046_s5, 5  ;;  %s214_s7 = scalar_lea.sflag [#allocation6], %s1046_s5 }
  0x48   : > { %s1050_s8 = scalar_lea.vmem [#allocation5], %s672_s6 }
  0x49   : > { %868 = dma.done.wait (%p1192_p4), %s214_s7, 512  }
  0x4a   : > { %870 = vsyncadd (%p1192_p4), %s214_s7, 4294966784  ;;  %v897_v0 = vmov 0.0   ;;  %v270_v1 = vld [vmem:[#allocation2 + $0x38] sm:$0xff]  ;;  %v269_v2 = vld [vmem:[#allocation2 + $0x30] sm:$0xff]  ;;  %vm271_vm0 = vcmask 261120   ;;  %s673_s23 = sshll.u32 %s947_s19, 2 }
  0x4b   : > { %360 = vmatprep.mubr.f32.mxu0 %v897_v0  ;;  %490 = vmatprep.mubr.f32.mxu1 %v897_v0  ;;  %v268_v3 = vld [vmem:[#allocation2 + $0x28] sm:$0xff]  ;;  %v267_v4 = vld [vmem:[#allocation2 + $0x20] sm:$0xff]  ;;  %v266_v5 = vld [vmem:[#allocation2 + $0x18] sm:$0xff]  ;;  %p248_p8 = scmp.lt.s32.totalorder %s673_s23, 7  ;;  %vm413_vm1 = vcmask 523264   ;;  %s693_s12 = smul.u32 96, %s1046_s5 }
  0x4c   : > { %320 = vmatprep.subr.mxu0 %v270_v1  ;;  %v265_v6 = vld [vmem:[#allocation2 + $0x10] sm:$0xff]  ;;  %v264_v7 = vld [vmem:[#allocation2 + $0x8] sm:$0xff]  ;;  %v263_v8 = vld [vmem:[#allocation2] sm:$0xff]  ;;  %s694_s13 = smul.u32 1536, %s947_s19  ;;  %s552_s6 = scalar_lea.sflag [#allocation4], %s1046_s5 }
  0x4d   : > { %321 = vmatpush1.msra.mxu0 %v269_v2  ;;  %v255_v9 = vld [vmem:[%s1174_s1] sm:$0xff]  ;;  %v256_v10 = vld [vmem:[%s1174_s1 + $0x8] sm:$0xff]  ;;  %v257_v11 = vld [vmem:[%s1174_s1 + $0x10] sm:$0xff]  ;;  %s1201_s23 = smov (!%p248_p8, %s673_s23), 7  ;;  %s1105_s11 = scalar_lea.vmem [#allocation7], %s693_s12 }
  0x4e   : > { %322 = vmatprep.subr.mxu0 %v268_v3  ;;  %v258_v12 = vld [vmem:[%s1174_s1 + $0x18] sm:$0xff]  ;;  %v259_v13 = vld [vmem:[%s1174_s1 + $0x20] sm:$0xff]  ;;  %v260_v14 = vld [vmem:[%s1174_s1 + $0x28] sm:$0xff]  ;;  %s674_s24 = sshll.u32 %s1201_s23, 3  ;;  %s566_s14 = sshll.u32 %s1105_s11, 4  ;;  %s1129_s14 = int_to_ptr.vmem [resolvable:$true] %s566_s14 }
  0x4f   : > { %323 = vmatpush1.msra.mxu0 %v267_v4  ;;  %v261_v15 = vld [vmem:[%s1174_s1 + $0x30] sm:$0xff]  ;;  %v262_v16 = vld [vmem:[%s1174_s1 + $0x38] sm:$0xff]  ;;  %s251_s29 = scalar_lea.vmem %s1173_s0, %s674_s24  ;;  %v527_v53 = vld [vmem:[%s1050_s8] sm:$0xff]  ;;  %s1127_s30 = scalar_lea.hbm %s1177_s4, %s694_s13 }
  0x50   : > { %324 = vmatprep.subr.mxu0 %v266_v5  ;;  %v409_v33 = vld [vmem:[%s251_s29] sm:$0xff]  ;;  %v410_v34 = vld [vmem:[%s251_s29 + $0x8] sm:$0xff]  ;;  %v411_v35 = vld [vmem:[%s251_s29 + $0x10] sm:$0xff]  ;;  %p1193_p11 = scmp.ne.s32.totalorder %s1187_s10, 0  ;;  %s898_s19 = smov [#allocation7]  }
  0x51   : > { %325 = vmatpush1.msra.mxu0 %v265_v6  ;;  %v412_v36 = vld [vmem:[%s251_s29 + $0x18] sm:$0xff]  ;;  %v528_v56 = vld [vmem:[%s1050_s8 + $0x8] sm:$0xff]  ;;  %v529_v60 = vld [vmem:[%s1050_s8 + $0x10] sm:$0xff]  ;;  %s825_s7 = sshll.u32 %s898_s19, 4  ;;  %s826_s7 = int_to_ptr.vmem [resolvable:$false] %s825_s7 }
  0x52   : > { %326 = vmatprep.subr.mxu0 %v264_v7  ;;  %s827_s21 = scalar_lea.vmem %s826_s7, 3072  ;;  %p828_p2 = scmp.lt.s32.totalorder %s1129_s14, %s826_s7 }
  0x53   : > { %327 = vmatpush1.msra.mxu0 %v263_v8 }
  0x54   : > { %675 = vmatmul.mubr.msk.f32.vlgmr.msra.gmra.mxu0 %vm271_vm0, %v255_v9 }
  0x55   : > { %366 = vmatprep.mubr.f32.mxu0 %v897_v0 }
  0x58   : > { %676 = vmatmul.mubr.msk.f32.gmra.mxu0 %vm271_vm0, %v256_v10 }
  0x59   : > { %372 = vmatprep.mubr.f32.mxu0 %v897_v0 }
  0x5c   : > { %677 = vmatmul.mubr.msk.f32.gmra.mxu0 %vm271_vm0, %v257_v11 }
  0x5d   : > { %378 = vmatprep.mubr.f32.mxu0 %v897_v0 }
  0x60   : > { %678 = vmatmul.mubr.msk.f32.gmra.mxu0 %vm271_vm0, %v258_v12 }
  0x61   : > { %384 = vmatprep.mubr.f32.mxu0 %v897_v0 }
  0x64   : > { %679 = vmatmul.mubr.msk.f32.gmra.mxu0 %vm271_vm0, %v259_v13 }
  0x65   : > { %390 = vmatprep.mubr.f32.mxu0 %v897_v0 }
  0x68   : > { %680 = vmatmul.mubr.msk.f32.gmra.mxu0 %vm271_vm0, %v260_v14 }
  0x69   : > { %396 = vmatprep.mubr.f32.mxu0 %v897_v0 }
  0x6c   : > { %681 = vmatmul.mubr.msk.f32.gmra.mxu0 %vm271_vm0, %v261_v15 }
  0x6d   : > { %402 = vmatprep.mubr.f32.mxu0 %v897_v0 }
  0x70   : > { %682 = vmatmul.mubr.msk.f32.gmra.mxu0 %vm271_vm0, %v262_v16 }
 0x114   : > { %v362_v17 = vpop.f32.mrf.mxu0 }
 0x116   : > { %v364_v18 = vpop.f32.mrf.mxu0 }
 0x118   : > { %v368_v19 = vpop.f32.mrf.mxu0 }
 0x11a   : > { %v370_v20 = vpop.f32.mrf.mxu0 }
 0x11c   : > { %v374_v21 = vpop.f32.mrf.mxu0 }
 0x11e   : > { %v376_v22 = vpop.f32.mrf.mxu0 }
 0x120   : > { %v380_v23 = vpop.f32.mrf.mxu0 }
 0x122   : > { %v382_v24 = vpop.f32.mrf.mxu0 }
 0x124   : > { %v386_v25 = vpop.f32.mrf.mxu0 }
 0x126   : > { %v388_v26 = vpop.f32.mrf.mxu0 }
 0x128   : > { %v392_v27 = vpop.f32.mrf.mxu0 }
 0x12a   : > { %v394_v28 = vpop.f32.mrf.mxu0 }
 0x12c   : > { %v398_v29 = vpop.f32.mrf.mxu0 }
 0x12e   : > { %v400_v30 = vpop.f32.mrf.mxu0 }
 0x130   : > { %v404_v31 = vpop.f32.mrf.mxu0 }
 0x132   : > { %v406_v32 = vpop.f32.mrf.mxu0 }
 0x133   : > { %442 = vmatprep.subr.mxu1 %v406_v32 }
 0x134   : > { %443 = vmatpush1.msra.mxu1 %v404_v31 }
 0x135   : > { %444 = vmatprep.subr.mxu1 %v400_v30 }
 0x136   : > { %445 = vmatpush1.msra.mxu1 %v398_v29 }
 0x137   : > { %446 = vmatprep.subr.mxu1 %v394_v28 }
 0x138   : > { %447 = vmatpush1.msra.mxu1 %v392_v27 }
 0x139   : > { %448 = vmatprep.subr.mxu1 %v388_v26 }
 0x13a   : > { %449 = vmatpush1.msra.mxu1 %v386_v25 }
 0x13b   : > { %450 = vmatprep.subr.mxu1 %v382_v24 }
 0x13c   : > { %451 = vmatpush1.msra.mxu1 %v380_v23 }
 0x13d   : > { %452 = vmatprep.subr.mxu1 %v376_v22 }
 0x13e   : > { %453 = vmatpush1.msra.mxu1 %v374_v21 }
 0x13f   : > { %454 = vmatprep.subr.mxu1 %v370_v20 }
 0x140   : > { %455 = vmatpush1.msra.mxu1 %v368_v19 }
 0x141   : > { %456 = vmatprep.subr.mxu1 %v364_v18 }
 0x142   : > { %457 = vmatpush1.msra.mxu1 %v362_v17 }
 0x143   : > { %683 = vmatmul.mubr.msk.f32.vlgmr.msra.gmra.mxu1 %vm413_vm1, %v409_v33 }
 0x144   : > { %496 = vmatprep.mubr.f32.mxu1 %v897_v0 }
 0x147   : > { %684 = vmatmul.mubr.msk.f32.gmra.mxu1 %vm413_vm1, %v410_v34 }
 0x148   : > { %502 = vmatprep.mubr.f32.mxu1 %v897_v0 }
 0x14b   : > { %685 = vmatmul.mubr.msk.f32.gmra.mxu1 %vm413_vm1, %v411_v35 }
 0x14c   : > { %508 = vmatprep.mubr.f32.mxu1 %v897_v0  ;;  %v530_v0 = vld [vmem:[%s1050_s8 + $0x18] sm:$0xff]  ;;  %s821_s8 = scalar_lea.vmem %s1129_s14, 1536 }
 0x14d   : > { %p822_p3 = scmp.ne.s32.totalorder %s1129_s14, %s821_s8  ;;  %p829_p13 = scmp.lt.s32.totalorder %s827_s21, %s821_s8 }
 0x14f   : > { %686 = vmatmul.mubr.msk.f32.gmra.mxu1 %vm413_vm1, %v412_v36  ;;  %p823_p12 = pnand %p822_p3, %p1193_p11  ;;  %p830_p0 = por %p829_p13, %p828_p2 }
 0x151   : > { %p824_p10 = pneg %p823_p12 }
 0x153   : > { %p831_p5 = pnand %p830_p0, %p824_p10 }
 0x203   : > { %v492_v37 = vpop.f32.mrf.mxu1 }
 0x204   : > { %543 = vst [vmem:[%s1105_s11 + $0x8] sm:$0xff] %v492_v37 }
 0x205   : > { %v494_v38 = vpop.f32.mrf.mxu1 }
 0x206   : > { %v515_v39 = vmul.f32 0.5, %v494_v38  ;;  %544 = vst [vmem:[%s1105_s11 + $0x10] sm:$0xff] %v494_v38 }
 0x207   : > { %v498_v40 = vpop.f32.mrf.mxu1 }
 0x208   : > { %v519_v41 = vmul.f32 1.442695, %v515_v39  ;;  %545 = vst [vmem:[%s1105_s11 + $0x20] sm:$0xff] %v498_v40 }
 0x209   : > { %v500_v42 = vpop.f32.mrf.mxu1 }
 0x20a   : > { %759 = vpow2.f32 %v519_v41  ;;  %v516_v43 = vmul.f32 0.5, %v500_v42  ;;  %546 = vst [vmem:[%s1105_s11 + $0x28] sm:$0xff] %v500_v42 }
 0x20b   : > { %v504_v44 = vpop.f32.mrf.mxu1 }
 0x20c   : > { %v521_v45 = vmul.f32 1.442695, %v516_v43  ;;  %547 = vst [vmem:[%s1105_s11 + $0x38] sm:$0xff] %v504_v44 }
 0x20d   : > { %v506_v46 = vpop.f32.mrf.mxu1 }
 0x20e   : > { %761 = vpow2.f32 %v521_v45  ;;  %v517_v47 = vmul.f32 0.5, %v506_v46  ;;  %548 = vst [vmem:[%s1105_s11 + $0x40] sm:$0xff] %v506_v46 }
 0x20f   : > { %v510_v48 = vpop.f32.mrf.mxu1 }
 0x210   : > { %v523_v49 = vmul.f32 1.442695, %v517_v47  ;;  %549 = vst [vmem:[%s1105_s11 + $0x50] sm:$0xff] %v510_v48 }
 0x211   : > { %v512_v50 = vpop.f32.mrf.mxu1 }
 0x212   : > { %763 = vpow2.f32 %v523_v49  ;;  %v518_v51 = vmul.f32 0.5, %v512_v50  ;;  %550 = vst [vmem:[%s1105_s11 + $0x58] sm:$0xff] %v512_v50 }
 0x214   : > { %v525_v52 = vmul.f32 1.442695, %v518_v51 }
 0x216   : > { %765 = vpow2.f32 %v525_v52 }
 0x217   : > { %v760_v54 = vpop.eup %759 }
 0x218   : > { %v531_v55 = vmul.f32 %v760_v54, %v527_v53 }
 0x21a   : > { %v535_v57 = vadd.f32 %v531_v55, %v492_v37 }
 0x21b   : > { %v762_v58 = vpop.eup %761 }
 0x21c   : > { %539 = vst [vmem:[%s1105_s11] sm:$0xff] %v535_v57  ;;  %v532_v59 = vmul.f32 %v762_v58, %v528_v56 }
 0x21e   : > { %v536_v61 = vadd.f32 %v532_v59, %v498_v40 }
 0x21f   : > { %v764_v62 = vpop.eup %763 }
 0x220   : > { %540 = vst [vmem:[%s1105_s11 + $0x18] sm:$0xff] %v536_v61  ;;  %v533_v63 = vmul.f32 %v764_v62, %v529_v60 }
 0x222   : > { %v537_v1 = vadd.f32 %v533_v63, %v504_v44 }
 0x223   : > { %v766_v2 = vpop.eup %765 }
 0x224   : > { %541 = vst [vmem:[%s1105_s11 + $0x30] sm:$0xff] %v537_v1  ;;  %v534_v3 = vmul.f32 %v766_v2, %v530_v0 }
 0x226   : > { %v538_v4 = vadd.f32 %v534_v3, %v510_v48 }
 0x228   : > { %542 = vst [vmem:[%s1105_s11 + $0x48] sm:$0xff] %v538_v4 }
 0x229   : > { %834 = shalt.err (!%p831_p5)
}
 0x22a   : > { %s835_s23 = scalar_lea.hbm %s1127_s30, 1536  ;;  %s839_s28 = scalar_lea.hbm %s1177_s4, 3072 }
 0x22b   : > { %p836_p9 = scmp.ne.s32.totalorder %s1127_s30, %s835_s23  ;;  %p840_p7 = scmp.lt.s32.totalorder %s1127_s30, %s1177_s4 }
 0x22c   : > { %p841_p4 = scmp.lt.s32.totalorder %s839_s28, %s835_s23 }
 0x22d   : > { %p837_p1 = pnand %p836_p9, %p1193_p11 }
 0x22e   : > { %p842_p8 = por %p841_p4, %p840_p7 }
 0x22f   : > { %p838_p6 = pneg %p837_p1 }
 0x231   : > { %p843_p3 = pnand %p842_p8, %p838_p6 }
 0x233   : > { %846 = shalt.err (!%p843_p3)
}
 0x234   : > { %s899_s11 = smov 384   ;;  %s900_s13 = smov 24  }
 0x235   : > { %701 = dma.vmem_to_hbm [thread:$0]  (%p1193_p11), %s1129_s14, 1536, %s1127_s30, %s552_s6, %s899_s11, %s899_s11, %s900_s13  }
 0x236 PF: > { %s581_s20 = sand.u32 1, %s877_s15   ;;  %p1194_p12 = scmp.ne.s32.totalorder %s1183_s22, 0 }
 0x237   : > { %p1195_p10 = scmp.ge.s32.totalorder %s889_s18, 2  ;;  %s582_s25 = scalar_lea.sflag [#allocation4], %s581_s20 }
 0x239   : > { %p712_p2 = pnand %p1195_p10, %p1194_p12 }
 0x23b   : > { %p713_p13 = pneg %p712_p2 }
 0x23d   : > { %872 = dma.done.wait (%p713_p13), %s582_s25, 1536  }
 0x23e   : > { %874 = vsyncadd (%p713_p13), %s582_s25, 4294965760  ;;  %p18_p0 = scmp.ge.s32.totalorder %s980_s27, 4   ;;  %s1196_s15 = smov %s881_s16 }
 0x23f   : > { %s1197_s16 = smov %s885_s17  ;;  %s1198_s17 = smov %s997_s9 }
 0x240   : > { %s1199_s18 = smov %s980_s27  ;;  %20 = sbr.rel (!%p18_p0) target bundleno = 6 (0x6), region = 89 }
 0x245   :  { %587 = vsyncpa [#allocation3], 1 }
 0x246   :  { %589 = vsyncpa [#allocation3 + $0x1], 1 }
 0x247   :  { %590 = vsyncpa [#allocation6], 1 }
 0x248   :  { %592 = vsyncpa [#allocation6 + $0x1], 1 }
 0x249   :  { %593 = vsyncpa [#allocation4], 1 }
 0x24a   :  { %595 = vsyncpa [#allocation4 + $0x1], 1 }

</bundles_post_ra>
